<compile_context>
chip_gen: v7x
topology: tpu7x:2x2x1
jax: 0.10.0
libtpu: 0.0.40
codegen_flags: <defaults>
</compile_context>

<pallas_src>
import functools
import numpy as np
import jax
import jax.numpy as jnp
from jax.experimental import pallas as pl
from jax.experimental.pallas import tpu as pltpu


def _round_up(a, b):
    return (a + b - 1) // b * b


# --------------------------------------------------------------------------
# Pallas kernel (one batch tile per grid step)
# --------------------------------------------------------------------------
def qsnn_kernel(x_t_ref, w1_ref, b1_ref, w2_ref, b2_ref, coef_ref, out_ref, *,
                dhat_index):
    # x_t_ref : [P, TILE_N]  full input, batch on the lane axis
    # w1_ref  : [H, P]       fc_nonparametric weight with zeroed column at dhat_index
    # b1_ref  : [H, 1]       fc_nonparametric bias
    # w2_ref  : [H, 1]       fc_final weight
    # b2_ref  : [1]  (SMEM)  fc_final bias
    # coef_ref: [1]  (SMEM)  dhat_coefficient
    # out_ref : [1, TILE_N]  lane-dense output
    x_t = x_t_ref[...]                                               # [P, TILE_N]
    h = jnp.dot(w1_ref[...], x_t,
                preferred_element_type=jnp.float32) + b1_ref[...]    # [H, TILE_N]
    a = jax.nn.sigmoid(h) * h                                        # HybridActivation
    # Width-1 "matmul" as VPU multiply + sublane reduce (MXU would waste 127/128 lanes).
    o = jnp.sum(a * w2_ref[...], axis=0, keepdims=True) + b2_ref[0]  # [1, TILE_N]
    dhat = x_t[dhat_index:dhat_index + 1, :]                         # [1, TILE_N]
    out_ref[...] = o + coef_ref[0] * dhat


# --------------------------------------------------------------------------
# Wrapper
# --------------------------------------------------------------------------
def qsnn_forward(x, params, dhat_index, tile_n_max=1024):
    """Forward pass of QuantileSemiparametricNN.

    x: [N, input_dim] float32
    params: dict with w1 [D,H], b1 [1,H], w2 [H,1], b2 [1], coef [1]
    returns: [N, 1] float32
    """
    N, P = x.shape
    D, H = params["w1"].shape
    assert D == P - 1

    # Fold dhat-column removal into the weight: insert a zero row at dhat_index
    # so the kernel consumes x exactly once (no gather / no [N, P-1] copy of x).
    w1 = params["w1"]
    zero_row = jnp.zeros((1, H), dtype=w1.dtype)
    w1_full_t = jnp.concatenate([w1[:dhat_index], zero_row, w1[dhat_index:]],
                                axis=0).T                            # [H, P]
    b1_col = params["b1"].reshape(H, 1)
    w2_col = params["w2"].reshape(H, 1)

    # Put the batch on the lane axis; pad N up to the tile size.
    TILE_N = min(tile_n_max, _round_up(N, 128))
    N_pad = _round_up(N, TILE_N)
    x_t = jnp.pad(x.astype(jnp.float32), ((0, N_pad - N), (0, 0))).T  # [P, N_pad]

    grid = (N_pad // TILE_N,)
    kernel = functools.partial(qsnn_kernel, dhat_index=dhat_index)

    cost = pl.CostEstimate(
        flops=2 * N * H * (D + 1),
        transcendentals=N * H,
        bytes_accessed=4 * (N * (P + 1) + P * H + 2 * H + 2),
    )

    out_t = pl.pallas_call(
        kernel,
        out_shape=jax.ShapeDtypeStruct((1, N_pad), jnp.float32),
        grid=grid,
        in_specs=[
            pl.BlockSpec((P, TILE_N), lambda i: (0, i)),              # x^T, tiled over batch
            pl.BlockSpec((H, P), lambda i: (0, 0)),                   # w1 (resident)
            pl.BlockSpec((H, 1), lambda i: (0, 0)),                   # b1 (resident)
            pl.BlockSpec((H, 1), lambda i: (0, 0)),                   # w2 (resident)
            pl.BlockSpec(memory_space=pltpu.MemorySpace.SMEM),        # b2 scalar
            pl.BlockSpec(memory_space=pltpu.MemorySpace.SMEM),        # coef scalar
        ],
        out_specs=pl.BlockSpec((1, TILE_N), lambda i: (0, i)),        # lane-dense output
        compiler_params=pltpu.CompilerParams(
            dimension_semantics=("parallel",),                        # 2 TCs on v7x
            vmem_limit_bytes=32 * 1024 * 1024,                        # safe on v5e/v6e/v7x
        ),
        cost_estimate=cost,
    )(x_t, w1_full_t, b1_col, w2_col, params["b2"], params["coef"])

    return out_t[0, :N][:, None]                                      # [N, 1]


# --------------------------------------------------------------------------
# Deterministic parameter construction (mirrors _initialize_weights)
# --------------------------------------------------------------------------
def make_params(input_dim, sample_size, m=1, seed=0):
    d = input_dim - 1
    alpha = 1.0
    r_n = int((sample_size / np.log(sample_size))
              ** (1.0 / (2.0 * (1.0 + alpha / (d + 1)))) * 10)
    hidden_dim = max(r_n, 1)
    B_n = np.sqrt(sample_size / np.log(sample_size))

    rng = np.random.RandomState(seed)

    W = rng.randn(input_dim - 1, hidden_dim)
    norms = np.maximum(np.linalg.norm(W, axis=0), 1.0)
    W = W / norms[None, :] ** m
    scale = B_n / np.sum(np.abs(W))
    W = W * min(scale, 1.0)                                # fc_nonparametric: x @ W

    v = rng.randn(hidden_dim, 1)
    scale = B_n / np.sum(np.abs(v))
    v = v * min(scale, 1.0)                                # fc_final: a @ v

    params = {
        "w1": jnp.asarray(W, dtype=jnp.float32),                       # [D, H]
        "b1": jnp.zeros((1, hidden_dim), dtype=jnp.float32),           # [1, H]
        "w2": jnp.asarray(v, dtype=jnp.float32),                       # [H, 1]
        "b2": jnp.zeros((1,), dtype=jnp.float32),                      # scalar
        "coef": jnp.zeros((1,), dtype=jnp.float32),                    # dhat_coefficient
    }
    return params, hidden_dim


# Pure-JAX reference for verification (mirrors the PyTorch forward).
def qsnn_reference(x, params, dhat_index):
    P = x.shape[1]
    keep = jnp.array([i for i in range(P) if i != dhat_index], dtype=jnp.int32)
    x_np = jnp.take(x, keep, axis=1)
    dhat = x[:, dhat_index][:, None]
    h = x_np @ params["w1"] + params["b1"]
    a = jax.nn.sigmoid(h) * h
    o = a @ params["w2"] + params["b2"][0]
    return o + params["coef"][0] * dhat


# --------------------------------------------------------------------------
if __name__ == "__main__":
    input_dim = 5
    sample_size = 128
    dhat_index = 2          # interior index exercises the zero-row insertion path
    batch = 8

    params, hidden_dim = make_params(input_dim, sample_size, m=1, seed=0)
    # Use non-trivial b2 / dhat_coefficient so the linear component is exercised
    # (forward math is identical to the module for any parameter values).
    params["b2"] = jnp.array([0.25], dtype=jnp.float32)
    params["coef"] = jnp.array([0.7], dtype=jnp.float32)

    key = jax.random.PRNGKey(0)
    x = jax.random.normal(key, (batch, input_dim), dtype=jnp.float32)

    out = qsnn_forward(x, params, dhat_index)
    out = jax.block_until_ready(out)

    ref = qsnn_reference(x, params, dhat_index)
    assert out.shape == (batch, 1)
    np.testing.assert_allclose(np.asarray(out), np.asarray(ref),
                               rtol=1e-5, atol=1e-5)

    print("KERNEL_OK")
</pallas_src>

<mosaic_0001>
module attributes {stable_mosaic.version = 11 : i64} {
  func.func @qsnn_kernel(%arg0: i32, %arg1: memref<5x128xf32, #tpu.memory_space<vmem>>, %arg2: memref<39x5xf32, #tpu.memory_space<vmem>>, %arg3: memref<39x1xf32, #tpu.memory_space<vmem>>, %arg4: memref<39x1xf32, #tpu.memory_space<vmem>>, %arg5: memref<1xf32, #tpu.memory_space<smem>>, %arg6: memref<1xf32, #tpu.memory_space<smem>>, %arg7: memref<1x128xf32, #tpu.memory_space<vmem>>) attributes {dimension_semantics = [#tpu.dimension_semantics<parallel>], iteration_bounds = array<i64: 1>, scalar_prefetch = 0 : i64, scratch_operands = 0 : i64, tpu.core_type = #tpu.core_type<tc>, window_params = [{transform_indices = @transform_0, window_bounds = array<i64: 5, 128>}, {pipeline_mode = #tpu.pipeline_mode<synchronous>, transform_indices = @transform_1, window_bounds = array<i64: 39, 5>}, {pipeline_mode = #tpu.pipeline_mode<synchronous>, transform_indices = @transform_2, window_bounds = array<i64: 39, 1>}, {pipeline_mode = #tpu.pipeline_mode<synchronous>, transform_indices = @transform_3, window_bounds = array<i64: 39, 1>}, {transform_indices = @transform_4, window_bounds = array<i64: 1>}, {transform_indices = @transform_5, window_bounds = array<i64: 1>}, {transform_indices = @transform_6, window_bounds = array<i64: 1, 128>}]} {
    %c0 = arith.constant 0 : index
    %c0_0 = arith.constant 0 : index
    %0 = vector.load %arg1[%c0, %c0_0] : memref<5x128xf32, #tpu.memory_space<vmem>>, vector<5x128xf32>
    %c0_1 = arith.constant 0 : index
    %c0_2 = arith.constant 0 : index
    %1 = vector.load %arg2[%c0_1, %c0_2] : memref<39x5xf32, #tpu.memory_space<vmem>>, vector<39x5xf32>
    %cst = arith.constant dense<0.000000e+00> : vector<39x128xf32>
    %2 = tpu.matmul %1, %0, %cst {dimension_numbers = #tpu.dot_dimension_numbers<[1], [0], [0], [1], [0, 0, 1, 1], [], []>} : vector<39x5xf32>, vector<5x128xf32>, vector<39x128xf32> -> vector<39x128xf32>
    %c0_3 = arith.constant 0 : index
    %c0_4 = arith.constant 0 : index
    %3 = vector.load %arg3[%c0_3, %c0_4] : memref<39x1xf32, #tpu.memory_space<vmem>>, vector<39x1xf32>
    %4 = vector.broadcast %3 : vector<39x1xf32> to vector<39x128xf32>
    %5 = arith.addf %2, %4 : vector<39x128xf32>
    %6 = arith.negf %5 : vector<39x128xf32>
    %7 = math.exp %6 : vector<39x128xf32>
    %cst_5 = arith.constant 1.000000e+00 : f32
    %8 = vector.broadcast %cst_5 : f32 to vector<39x128xf32>
    %9 = arith.addf %8, %7 : vector<39x128xf32>
    %10 = arith.divf %8, %9 : vector<39x128xf32>
    %11 = arith.mulf %10, %5 : vector<39x128xf32>
    %c0_6 = arith.constant 0 : index
    %c0_7 = arith.constant 0 : index
    %12 = vector.load %arg4[%c0_6, %c0_7] : memref<39x1xf32, #tpu.memory_space<vmem>>, vector<39x1xf32>
    %13 = vector.broadcast %12 : vector<39x1xf32> to vector<39x128xf32>
    %14 = arith.mulf %11, %13 : vector<39x128xf32>
    %cst_8 = arith.constant dense<0.000000e+00> : vector<128xf32>
    %15 = vector.multi_reduction <add>, %14, %cst_8 [0] : vector<39x128xf32> to vector<128xf32>
    %16 = vector.shape_cast %15 : vector<128xf32> to vector<1x128xf32>
    %c0_9 = arith.constant 0 : index
    %17 = memref.load %arg5[%c0_9] : memref<1xf32, #tpu.memory_space<smem>>
    %18 = vector.broadcast %17 : f32 to vector<1x128xf32>
    %19 = arith.addf %16, %18 : vector<1x128xf32>
    %20 = vector.extract_strided_slice %0 {offsets = [2, 0], sizes = [1, 128], strides = [1, 1]} : vector<5x128xf32> to vector<1x128xf32>
    %c0_10 = arith.constant 0 : index
    %21 = memref.load %arg6[%c0_10] : memref<1xf32, #tpu.memory_space<smem>>
    %22 = vector.broadcast %21 : f32 to vector<1x128xf32>
    %23 = arith.mulf %22, %20 : vector<1x128xf32>
    %24 = arith.addf %19, %23 : vector<1x128xf32>
    %c0_11 = arith.constant 0 : index
    %c0_12 = arith.constant 0 : index
    %25 = vector.load %arg7[%c0_11, %c0_12] : memref<1x128xf32, #tpu.memory_space<vmem>>, vector<1x128xf32>
    tpu.vector_store %arg7[%c0_11, %c0_12], %24 {strides = array<i32>} : memref<1x128xf32, #tpu.memory_space<vmem>>, vector<1x128xf32>,
    return
  }
  func.func @transform_0(%arg0: i32) -> (i32, i32) {
    %c0_i32 = arith.constant 0 : i32
    %c0_i32_0 = arith.constant 0 : i32
    return %c0_i32, %arg0 : i32, i32
  }
  func.func @transform_1(%arg0: i32) -> (i32, i32) {
    %c0_i32 = arith.constant 0 : i32
    %c0_i32_0 = arith.constant 0 : i32
    %c0_i32_1 = arith.constant 0 : i32
    return %c0_i32, %c0_i32_0 : i32, i32
  }
  func.func @transform_2(%arg0: i32) -> (i32, i32) {
    %c0_i32 = arith.constant 0 : i32
    %c0_i32_0 = arith.constant 0 : i32
    %c0_i32_1 = arith.constant 0 : i32
    return %c0_i32, %c0_i32_0 : i32, i32
  }
  func.func @transform_3(%arg0: i32) -> (i32, i32) {
    %c0_i32 = arith.constant 0 : i32
    %c0_i32_0 = arith.constant 0 : i32
    %c0_i32_1 = arith.constant 0 : i32
    return %c0_i32, %c0_i32_0 : i32, i32
  }
  func.func @transform_4(%arg0: i32) -> i32 {
    %c0_i32 = arith.constant 0 : i32
    %c0_i32_0 = arith.constant 0 : i32
    return %c0_i32 : i32
  }
  func.func @transform_5(%arg0: i32) -> i32 {
    %c0_i32 = arith.constant 0 : i32
    %c0_i32_0 = arith.constant 0 : i32
    return %c0_i32 : i32
  }
  func.func @transform_6(%arg0: i32) -> (i32, i32) {
    %c0_i32 = arith.constant 0 : i32
    %c0_i32_0 = arith.constant 0 : i32
    return %c0_i32, %arg0 : i32, i32
  }
}

</mosaic_0001>

<bundles_post_ra>
// kernel: tpu_custom_call.1
= control target key start
LH: loop header
LB: loop body
LE: loop exit
PB: predicated region body
PF: predicated region fallthrough
CT: control target
= control target key end

     0   :  { %vm78_vm0 = vcmask 1044480   ;;  %v362_v1 = vmov 0.0   ;;  %vm62_vm1 = vcmask 39936   ;;  %vm363_vm2 = vmmov 0   ;;  %s482_s0 = inlined_call_operand.vmem [shape: f32[5,128], index: 0, kind: input, shape index: {}]   ;;  %s483_s1 = inlined_call_operand.vmem [shape: f32[39,5], index: 1, kind: input, shape index: {}]   ;;  %s484_s2 = inlined_call_operand.vmem [shape: f32[39,1], index: 2, kind: input, shape index: {}]   ;;  %s485_s3 = inlined_call_operand.vmem [shape: f32[39,1], index: 3, kind: input, shape index: {}]   ;;  %s486_s4 = inlined_call_operand.<no memory space> [shape: f32[1], index: 4, kind: input, shape index: {}]   ;;  %s487_s5 = inlined_call_operand.<no memory space> [shape: f32[1], index: 5, kind: input, shape index: {}]   ;;  %s488_s6 = inlined_call_operand.hbm [shape: f32[1,128], index: 6, kind: output, shape index: {}]  }
   0x1   :  { %v404_v0 = vld [vmem:[%s482_s0] sm:$0x1f]  ;;  %293 = vmatprep.subr.mxu0 %v362_v1  ;;  %310 = vmatprep.subr.mxu1 %v362_v1  ;;  %v30_v3 = vld [vmem:[%s483_s1 + $0x18] sm:$0xff]  ;;  %v34_v5 = vld [vmem:[%s484_s2 + $0x10] sm:$0xff] }
   0x2   :  { %v27_v2 = vld [vmem:[%s483_s1] sm:$0xff]  ;;  %294 = vmatpush3.msk.msra.mxu0 %vm78_vm0, %v404_v0  ;;  %311 = vmatpush3.msk.msra.mxu1 %vm78_vm0, %v404_v0  ;;  %v28_v6 = vld [vmem:[%s483_s1 + $0x8] sm:$0xff] }
   0x3   :  { %295 = vmatprep.mubr.msk.f32.mxu0 %vm363_vm2, %v362_v1  ;;  %304 = vmatprep.mubr.msk.f32.mxu1 %vm363_vm2, %v362_v1  ;;  %v32_v4 = vld [vmem:[%s484_s2] sm:$0xff] }
   0x4   :  { %296 = vmatmul.mubr.msk.f32.vlgmr.msra.gmra.mrb[0].mxu0 %vm62_vm1, %v27_v2  ;;  %305 = vmatmul.mubr.msk.f32.vlgmr.msra.gmra.mrb[0].mxu1 %vm62_vm1, %v30_v3  ;;  %v31_v7 = vld [vmem:[%s483_s1 + $0x20] sm:$0x7f] }
   0x5   :  { %298 = vmatprep.mubr.msk.f32.mxu0 %vm363_vm2, %v362_v1  ;;  %307 = vmatprep.mubr.msk.f32.mxu1 %vm363_vm2, %v362_v1 }
   0x6   :  { %13 = vsyncpa [#allocation5], 0  ;;  %v364_v8 = vmov 0   ;;  %v33_v9 = vld [vmem:[%s484_s2 + $0x8] sm:$0xff]  ;;  %v35_v10 = vld [vmem:[%s484_s2 + $0x18] sm:$0xff]  ;;  %vm245_vm3 = vcmask 1046528  }
   0x7   :  { %316 = vset.pattern.permute.xlu0 %v364_v8  ;;  %317 = vset.pattern.permute.xlu1 %v364_v8  ;;  %v29_v11 = vld [vmem:[%s483_s1 + $0x10] sm:$0xff]  ;;  %v36_v12 = vld [vmem:[%s484_s2 + $0x20] sm:$0x7f]  ;;  %v208_v14 = vld [vmem:[%s485_s3 + $0x8] sm:$0xff]  ;;  %s365_s28 = smov [#allocation4]  }
   0x8   :  { %39 = vperm.xlu0 %316, %v32_v4   ;;  %49 = vperm.xlu1 %317, %v34_v5   ;;  %v207_v13 = vld [vmem:[%s485_s3] sm:$0xff]  ;;  %v209_v15 = vld [vmem:[%s485_s3 + $0x10] sm:$0xff]  ;;  %v210_v16 = vld [vmem:[%s485_s3 + $0x18] sm:$0xff]  ;;  %s268_s29 = sshll.u32 %s365_s28, 4  ;;  %s269_s29 = int_to_ptr.vmem [resolvable:$true] %s268_s29 }
   0x9   :  { %299 = vmatmul.mubr.msk.f32.gmra.mrb[2].mxu0 %vm62_vm1, %v28_v6  ;;  %308 = vmatmul.mubr.msk.f32.gmra.mrb[2].mxu1 %vm62_vm1, %v31_v7  ;;  %v211_v17 = vld [vmem:[%s485_s3 + $0x20] sm:$0x7f]  ;;  %s338_s30 = scalar_lea.vmem %s269_s29, 16  ;;  %s342_s7 = scalar_lea.vmem %s269_s29, 32 }
   0xa   :  { %301 = vmatprep.mubr.msk.f32.mxu0 %vm363_vm2, %v362_v1  ;;  %p339_p0 = scmp.ne.s32.totalorder %s269_s29, %s338_s30  ;;  %p343_p1 = scmp.lt.s32.totalorder %s269_s29, %s269_s29 }
   0xb   :  { %p344_p2 = scmp.lt.s32.totalorder %s342_s7, %s338_s30 }
   0xc   :  { %44 = vperm.xlu0 %316, %v33_v9   ;;  %54 = vperm.xlu1 %317, %v35_v10  }
   0xd   :  { %302 = vmatmul.mubr.msk.f32.gmra.mrb[4].mxu0 %vm62_vm1, %v29_v11  ;;  %p345_p3 = por %p344_p2, %p343_p1 }
   0xf   :  { %p346_p4 = pnand %p345_p3, %p339_p0 }
  0x10   :  { %59 = vperm.xlu0 %316, %v36_v12   ;;  %214 = vperm.xlu1 %317, %v207_v13  }
  0x14   :  { %219 = vperm.xlu0 %316, %v208_v14   ;;  %224 = vperm.xlu1 %317, %v209_v15  }
  0x18   :  { %229 = vperm.xlu0 %316, %v210_v16   ;;  %234 = vperm.xlu1 %317, %v211_v17  }
  0x87   :  { %v40_v18 = vpop.permute.xlu0 %39  ;;  %v50_v19 = vpop.permute.xlu1 %49 }
  0x8b   :  { %v45_v20 = vpop.permute.xlu0 %44  ;;  %v55_v21 = vpop.permute.xlu1 %54 }
  0x8f   :  { %v60_v28 = vpop.permute.xlu0 %59  ;;  %v215_v53 = vpop.permute.xlu1 %214 }
  0x93   :  { %v225_v58 = vpop.permute.xlu1 %224  ;;  %v220_v61 = vpop.permute.xlu0 %219 }
  0x97   :  { %v235_v6 = vpop.permute.xlu1 %234  ;;  %v230_v8 = vpop.permute.xlu0 %229 }
  0xd7   :  { %v148_v22 = vpop.f32.mrb[0].mxu0  ;;  %v163_v23 = vpop.f32.mrb[0].mxu1 }
  0xd8   :  { %v149_v24 = vadd.f32 %v148_v22, %v40_v18  ;;  %v164_v25 = vadd.f32 %v163_v23, %v55_v21  ;;  %v297_v26 = vpop.f32.mrb[1].mxu0  ;;  %v306_v27 = vpop.f32.mrb[1].mxu1  ;;  %v255_v21 = vstv %s486_s4 }
  0xda   :  { %v282_v29 = vmul.f32 -1.442695, %v149_v24  ;;  %v285_v30 = vmul.f32 -1.442695, %v164_v25 }
  0xdc   :  { %v153_v31 = vpop.f32.mrb[2].mxu0  ;;  %v168_v32 = vpop.f32.mrb[2].mxu1  ;;  %318 = vpow2.f32 %v282_v29 }
  0xdd   :  { %v154_v33 = vadd.f32 %v153_v31, %v45_v20  ;;  %v169_v34 = vadd.f32 %v168_v32, %v60_v28  ;;  %v300_v35 = vpop.f32.mrb[3].mxu0  ;;  %v309_v36 = vpop.f32.mrb[3].mxu1  ;;  %320 = vpow2.f32 %v285_v30 }
  0xdf   :  { %v283_v37 = vmul.f32 -1.442695, %v154_v33  ;;  %v286_v38 = vmul.f32 -1.442695, %v169_v34 }
  0xe0   :  { %v158_v39 = vpop.f32.mrb[4].mxu0 }
  0xe1   :  { %322 = vpow2.f32 %v283_v37  ;;  %v159_v40 = vadd.f32 %v158_v39, %v50_v19  ;;  %v303_v41 = vpop.f32.mrb[5].mxu0  ;;  %v258_v19 = vstv %s487_s5 }
  0xe2   :  { %324 = vpow2.f32 %v286_v38  ;;  %v259_v22 = vmul.f32 %v258_v19, %v404_v0 }
  0xe3   :  { %v284_v42 = vmul.f32 -1.442695, %v159_v40 }
  0xe5   :  { %326 = vpow2.f32 %v284_v42 }
  0xe6   :  { %v319_v43 = vpop.eup %318 }
  0xe7   :  { %v187_v44 = vadd.f32 1.0, %v319_v43  ;;  %v321_v45 = vpop.eup %320 }
  0xe8   :  { %v190_v48 = vadd.f32 1.0, %v321_v45 }
  0xe9   :  { %328 = vrcp.f32 %v187_v44 }
  0xeb   :  { %v323_v46 = vpop.eup %322 }
  0xec   :  { %v325_v47 = vpop.eup %324  ;;  %v188_v49 = vadd.f32 1.0, %v323_v46 }
  0xed   :  { %v191_v50 = vadd.f32 1.0, %v325_v47 }
  0xee   :  { %330 = vrcp.f32 %v188_v49 }
  0xef   :  { %v327_v51 = vpop.eup %326  ;;  %332 = vrcp.f32 %v191_v50 }
  0xf0   :  { %334 = vrcp.f32 %v190_v48  ;;  %v189_v52 = vadd.f32 1.0, %v327_v51 }
  0xf2   :  { %336 = vrcp.f32 %v189_v52 }
  0xf3   :  { %v329_v54 = vpop.eup %328 }
  0xf4   :  { %v202_v55 = vmul.f32 %v329_v54, %v149_v24 }
  0xf6   :  { %v237_v62 = vmul.f32 %v215_v53, %v202_v55 }
  0xf8   :  { %v331_v56 = vpop.eup %330 }
  0xf9   :  { %v333_v57 = vpop.eup %332  ;;  %v203_v59 = vmul.f32 %v331_v56, %v154_v33 }
  0xfa   :  { %v335_v60 = vpop.eup %334  ;;  %v206_v2 = vmul.f32 %v333_v57, %v169_v34 }
  0xfb   :  { %v238_v63 = vmul.f32 %v220_v61, %v203_v59  ;;  %v205_v3 = vmul.f32 %v335_v60, %v164_v25 }
  0xfc   :  { %v337_v1 = vpop.eup %336  ;;  %v241_v9 = vmul.f32 %v235_v6, %v206_v2 }
  0xfd   :  { %v242_v4 = vadd.f32 %v238_v63, %v237_v62  ;;  %v204_v5 = vmul.f32 %v337_v1, %v159_v40  ;;  %v240_v10 = vmul.f32 %v230_v8, %v205_v3 }
  0xfe   :  { %v246_v13 = vsel %vm245_vm3, %v241_v9, 0.0 }
  0xff   :  { %v239_v7 = vmul.f32 %v225_v58, %v204_v5 }
 0x101   :  { %v243_v11 = vadd.f32 %v242_v4, %v239_v7 }
 0x103   :  { %v244_v12 = vadd.f32 %v243_v11, %v240_v10 }
 0x105   :  { %v247_v14 = vadd.f32 %v246_v13, %v244_v12 }
 0x107   :  { %v248_v15 = vrot.slane %v247_v14, 4 }
 0x109   :  { %v249_v16 = vadd.f32 %v248_v15, %v247_v14 }
 0x10b   :  { %v250_v17 = vrot.slane %v249_v16, 2 }
 0x10d   :  { %v251_v18 = vadd.f32 %v250_v17, %v249_v16 }
 0x10f   :  { %v252_v20 = vrot.slane %v251_v18, 1 }
 0x111   :  { %v253_v23 = vadd.f32 %v252_v20, %v251_v18 }
 0x113   :  { %v256_v24 = vadd.f32 %v255_v21, %v253_v23 }
 0x115   :  { %v260_v25 = vadd.f32 %v259_v22, %v256_v24 }
 0x117   :  { %261 = vst [vmem:[#allocation4 - $0x2] sm:$0x4] %v260_v25 }
 0x118   :  { %349 = shalt.err (!%p346_p4)
}
 0x119   :  { %s350_s4 = scalar_lea.hbm %s488_s6, 16 }
 0x11a   :  { %p351_p5 = scmp.ne.s32.totalorder %s488_s6, %s350_s4  ;;  %p354_p6 = scmp.lt.u32.totalorder %s350_s4, %s488_s6 }
 0x11c   :  { %p356_p7 = pnand %p354_p6, %p351_p5 }
 0x11e   :  { %359 = shalt.err (!%p356_p7)
}
 0x11f   :  { %271 = dma.vmem_to_hbm [thread:$0]  %s269_s29, 16, %s488_s6, [#allocation5]  }
 0x120   :  { %360 = dma.done.wait [#allocation5], 16  }
 0x121   :  { %361 = vsyncadd [#allocation5], 4294967280 }
 0x122   :  { %275 = vsyncpa [#allocation5], 1 }

</bundles_post_ra>
